<compile_context>
chip_gen: v6e
topology: v6e:2x2x1
jax: 0.10.0
libtpu: 0.0.40
codegen_flags: <defaults>
</compile_context>

<pallas_src>
import functools
import math

import jax
import jax.numpy as jnp
from jax import lax
from jax.experimental import pallas as pl
from jax.experimental.pallas import tpu as pltpu


def _cdiv(a, b):
    return -(-a // b)


def _round_up(a, b):
    return _cdiv(a, b) * b


# ---------------------------------------------------------------------------
# Generation-aware static configuration.
# ---------------------------------------------------------------------------
@functools.lru_cache(maxsize=1)
def _tpu_config():
    """Best-effort (prefer_256_row_tiles, multi_tensorcore, vmem_capacity)."""
    kind = ""
    try:
        kind = jax.devices()[0].device_kind.lower()
    except Exception:
        pass
    capacity = None
    try:
        capacity = int(pltpu.get_tpu_info().vmem_capacity_bytes)
    except Exception:
        capacity = None
    if capacity is None:
        # v7x: 64 MiB per TensorCore; v5e/v6e: 128 MiB.  Unknown -> conservative.
        capacity = 64 * 2**20 if "v7" in kind else 128 * 2**20
    prefer_256 = ("v6" in kind) or ("v7" in kind)   # 256-wide MXU generations
    multi_core = "v7" in kind                       # 2 TensorCores per chip
    return prefer_256, multi_core, capacity


def _batch_tile(batch, prefer_256, multi_core):
    """Rows per batch tile (always a multiple of 8)."""
    base = 256 if prefer_256 else 128               # fill the MXU row dimension
    if batch <= 16:
        return max(8, _round_up(batch, 8))          # too small to split
    # On v7x force >=2 tiles so dimension_semantics=('parallel',) actually
    # feeds both TensorCores; otherwise only tile when the batch exceeds one
    # MXU-height block.
    n_tiles = max(2 if multi_core else 1, _cdiv(batch, base))
    return _round_up(_cdiv(batch, n_tiles), 8)


# ---------------------------------------------------------------------------
# Parameter preparation: pad feature dims to 128 lanes, pre-cast to bf16 once.
# ---------------------------------------------------------------------------
def prepare_params(params, use_bf16):
    """Returns (prepared, m_orig).

    prepared[l] = (W_pad (N_pad, M_pad) bf16-or-f32, b_pad (1, M_pad) f32),
    with N_pad/M_pad rounded up to 128.  Zero padding keeps the chain exact:
    padded input rows only ever multiply zero activations and padded output
    columns stay exactly zero through bias(=0)+ReLU, so they contribute
    nothing to norms or goodness.  m_orig[l] is the original output width used
    for the goodness mean.
    """
    prepared = []
    m_orig = []
    for (w, b) in params:
        n, m = w.shape
        n_pad = _round_up(n, 128)
        m_pad = _round_up(m, 128)
        w_p = jnp.pad(w.astype(jnp.float32), ((0, n_pad - n), (0, m_pad - m)))
        if use_bf16:
            w_p = w_p.astype(jnp.bfloat16)
        b_p = jnp.pad(b.astype(jnp.float32), (0, m_pad - m)).reshape(1, m_pad)
        prepared.append((w_p, b_p))
        m_orig.append(m)
    return tuple(prepared), tuple(m_orig)


# ---------------------------------------------------------------------------
# Fused layer-chain kernel.
# ---------------------------------------------------------------------------
def _make_ff_chain_kernel(m_orig, use_bf16):
    num_layers = len(m_orig)

    def kernel(*refs):
        x_ref = refs[0]
        wb_refs = refs[1:1 + 2 * num_layers]
        h_ref = refs[1 + 2 * num_layers]
        g_ref = refs[2 + 2 * num_layers]

        bt = x_ref.shape[0]
        x = x_ref[...].astype(jnp.float32)                  # (Bt, N0_pad)
        # Sum-of-squares of the live activation: computed ONCE per layer
        # boundary and reused both as the goodness of that layer's output and
        # as the next layer's input norm (padded columns are exactly zero).
        ss = jnp.sum(x * x, axis=1, keepdims=True)          # (Bt, 1)
        g_col = jnp.zeros((bt, 1), jnp.float32)

        for l in range(num_layers):
            w_ref = wb_refs[2 * l]
            b_ref = wb_refs[2 * l + 1]

            if use_bf16:
                # Single EUP rsqrt per layer; +1e-8 keeps zero rows finite
                # (== torch's 1/(sqrt(0)+1e-4)) within the fast-path tolerance.
                lhs = (x * lax.rsqrt(ss + 1e-8)).astype(jnp.bfloat16)
            else:
                lhs = x / (jnp.sqrt(ss) + 1e-4)             # exact torch semantics

            h = jnp.dot(lhs, w_ref[...], preferred_element_type=jnp.float32)
            h = jnp.maximum(h + b_ref[...].astype(jnp.float32), 0.0)

            ss = jnp.sum(h * h, axis=1, keepdims=True)      # fused reduction
            g_col = g_col + ss * (1.0 / m_orig[l])          # mean over ORIGINAL M_l
            x = h

        h_ref[...] = x.astype(h_ref.dtype)                  # lane-dense (Bt, M_pad)
        g_ref[...] = g_col.astype(g_ref.dtype)              # tiny (Bt, 1) column

    return kernel


# ---------------------------------------------------------------------------
# pallas_call wrapper.
# ---------------------------------------------------------------------------
@functools.partial(
    jax.jit,
    static_argnames=("m_orig", "use_bf16", "bt", "vmem_limit", "single_buffer"))
def _ff_chain_jit(x, prepared, *, m_orig, use_bf16, bt, vmem_limit, single_buffer):
    num_layers = len(m_orig)
    B, n0 = x.shape
    n0_pad = prepared[0][0].shape[0]
    m_last = m_orig[-1]
    m_last_pad = prepared[-1][0].shape[1]
    assert n0 <= n0_pad

    b_pad = _round_up(B, bt)
    x_pad = x.astype(jnp.float32)
    if b_pad != B or n0_pad != n0:
        x_pad = jnp.pad(x_pad, ((0, b_pad - B), (0, n0_pad - n0)))
    n_tiles = b_pad // bt

    flat_inputs = [x_pad]
    in_specs = [pl.BlockSpec((bt, n0_pad), lambda i: (i, 0))]
    # Constant index_map -> weights/biases stay VMEM-resident across batch
    # tiles; Buffered(1) drops the pointless second buffer for them.
    wb_mode = pl.Buffered(1) if single_buffer else None
    for (w, b) in prepared:
        n_l, m_l = w.shape
        flat_inputs.append(w)
        flat_inputs.append(b)
        in_specs.append(pl.BlockSpec((n_l, m_l), lambda i: (0, 0),
                                     pipeline_mode=wb_mode))
        in_specs.append(pl.BlockSpec((1, m_l), lambda i: (0, 0),
                                     pipeline_mode=wb_mode))

    out_specs = [
        pl.BlockSpec((bt, m_last_pad), lambda i: (i, 0)),   # lane-dense final h
        pl.BlockSpec((bt, 1), lambda i: (i, 0)),            # goodness column (tiny)
    ]
    out_shape = (
        jax.ShapeDtypeStruct((b_pad, m_last_pad), jnp.float32),
        jax.ShapeDtypeStruct((b_pad, 1), jnp.float32),
    )

    flops = sum(2 * b_pad * w.shape[0] * w.shape[1] + 5 * b_pad * w.shape[1]
                for (w, _) in prepared)
    wb_bytes = sum(w.size * w.dtype.itemsize + b.size * b.dtype.itemsize
                   for (w, b) in prepared)
    cost = pl.CostEstimate(
        flops=int(flops),
        transcendentals=int(b_pad * num_layers),
        bytes_accessed=int(x_pad.size * 4 + wb_bytes
                           + b_pad * m_last_pad * 4 + b_pad * 4))

    kernel = _make_ff_chain_kernel(m_orig, use_bf16)
    h, g = pl.pallas_call(
        kernel,
        out_shape=out_shape,
        grid_spec=pltpu.PrefetchScalarGridSpec(
            num_scalar_prefetch=0,
            grid=(n_tiles,),
            in_specs=in_specs,
            out_specs=out_specs,
        ),
        compiler_params=pltpu.CompilerParams(
            dimension_semantics=("parallel",),   # batch tiles shard across TCs
            vmem_limit_bytes=vmem_limit,
        ),
        cost_estimate=cost,
    )(*flat_inputs)

    return h[:B, :m_last], g[:B, 0]


_SINGLE_BUFFER_OK = None   # cached: does this JAX accept pl.Buffered(1)?


def ff_chain_from_prepared(x, prepared, m_orig, use_bf16=True):
    """Run the fused FF chain on already padded / pre-cast parameters."""
    assert len(prepared) >= 1
    B = x.shape[0]
    prefer_256, multi_core, vmem_cap = _tpu_config()
    bt = _batch_tile(B, prefer_256, multi_core)

    n0_pad = prepared[0][0].shape[0]
    m_last_pad = prepared[-1][0].shape[1]
    wb_bytes = sum(w.size * w.dtype.itemsize + b.size * b.dtype.itemsize
                   for (w, b) in prepared)
    max_dim = max([n0_pad] + [w.shape[1] for (w, _) in prepared])
    # Budget: double-buffered x tile + (single-buffered) resident weights +
    # double-buffered outputs + live f32 intermediates, 2x headroom, capped at
    # ~78% of this generation's physical VMEM.
    est = (2 * bt * n0_pad * 4 + wb_bytes
           + 2 * (bt * m_last_pad * 4 + bt * 4) + 6 * bt * max_dim * 4)
    vmem_limit = int(min(max(2 * est, 16 * 2**20), (vmem_cap * 25) // 32))
    # TODO(synk): if `est` exceeds the VMEM cap (very large feature dims), use
    #   a K/M-tiled weight fallback instead of resident weights.

    global _SINGLE_BUFFER_OK
    kwargs = dict(m_orig=tuple(m_orig), use_bf16=bool(use_bf16), bt=int(bt),
                  vmem_limit=vmem_limit)
    if _SINGLE_BUFFER_OK is not False:
        try:
            out = _ff_chain_jit(x, prepared, single_buffer=True, **kwargs)
            _SINGLE_BUFFER_OK = True
            return out
        except Exception:
            _SINGLE_BUFFER_OK = False   # older JAX: fall back to default buffering
    return _ff_chain_jit(x, prepared, single_buffer=False, **kwargs)


def ff_chain_forward(x, params, use_bf16=True):
    """Convenience wrapper: raw (W (N,M), b (M,)) f32 params -> (h_last, goodness)."""
    prepared, m_orig = prepare_params(tuple(params), use_bf16)
    return ff_chain_from_prepared(x, prepared, m_orig, use_bf16=use_bf16)


# ---------------------------------------------------------------------------
# Module-like wrapper (inference paths of the PyTorch FF module).
# ---------------------------------------------------------------------------
def _rand_linear(key, n, m):
    # torch.nn.Linear default init: U(-1/sqrt(N), 1/sqrt(N)) for W and b.
    kw, kb = jax.random.split(key)
    bound = 1.0 / math.sqrt(n)
    w = jax.random.uniform(kw, (n, m), jnp.float32, -bound, bound)
    b = jax.random.uniform(kb, (m,), jnp.float32, -bound, bound)
    return w, b


class FFPallas:
    """JAX/Pallas port of the FF module's inference paths (forward / call)."""

    def __init__(self, use_bf16=True):
        self.params = []          # list of (W (N, M) f32, b (M,) f32)
        self.use_bf16 = use_bf16
        self._prepared = None     # cached padded / pre-cast params
        self._m_orig = None

    def add_layer(self, key, N, M):
        self.params.append(_rand_linear(key, N, M))
        self._prepared = None     # invalidate cache

    def _get_prepared(self):
        if self._prepared is None:
            # Pad to 128-lane feature dims and cast to bf16 ONCE, not per call.
            self._prepared, self._m_orig = prepare_params(
                tuple(self.params), self.use_bf16)
        return self._prepared, self._m_orig

    def forward(self, x):
        """FF.forward(x_pos, x_neg=None): chain layers, return final activations."""
        prepared, m_orig = self._get_prepared()
        h, _ = ff_chain_from_prepared(x, prepared, m_orig, use_bf16=self.use_bf16)
        return h

    def call(self, x):
        """FF.call(x): per-sample goodness summed over all layers."""
        prepared, m_orig = self._get_prepared()
        _, g = ff_chain_from_prepared(x, prepared, m_orig, use_bf16=self.use_bf16)
        return g


def _reference_forward_and_call(x, params):
    """Pure-jnp reference of the same math for a sanity check."""
    goodness = jnp.zeros((x.shape[0],), jnp.float32)
    for w, b in params:
        nrm = jnp.sqrt(jnp.sum(x * x, axis=1, keepdims=True))
        xd = x / (nrm + 1e-4)
        x = jnp.maximum(xd @ w + b, 0.0)
        goodness = goodness + jnp.mean(x * x, axis=1)
    return x, goodness


if __name__ == "__main__":
    key = jax.random.PRNGKey(0)
    k_x, k_l1, k_l2, k_x2, k_l3, k_l4 = jax.random.split(key, 6)

    # --- Small demo: 2-layer chain, tiny shapes (single batch tile) -------
    B, N, H1, H2 = 8, 32, 64, 32
    x = jax.random.normal(k_x, (B, N), jnp.float32)

    net = FFPallas(use_bf16=True)
    net.add_layer(k_l1, N, H1)
    net.add_layer(k_l2, H1, H2)
    params = tuple(net.params)

    ref_out, ref_good = _reference_forward_and_call(x, params)

    # Precise path (f32 MXU operands, exact torch-style norm) -- tight tol.
    h32, g32 = ff_chain_forward(x, params, use_bf16=False)
    jax.block_until_ready((h32, g32))
    assert h32.shape == (B, H2) and g32.shape == (B,)
    assert jnp.allclose(h32, ref_out, atol=1e-4, rtol=1e-3)
    assert jnp.allclose(g32, ref_good, atol=1e-4, rtol=1e-3)

    # Fast path (bf16 MXU operands + rsqrt) used by the class wrappers.
    out = net.forward(x)
    goodness = net.call(x)
    jax.block_until_ready((out, goodness))
    assert out.shape == (B, H2) and goodness.shape == (B,)
    assert jnp.allclose(out, ref_out, atol=5e-2, rtol=5e-2)
    assert jnp.allclose(goodness, ref_good, atol=5e-2, rtol=5e-2)

    # --- Multi-tile / padded-feature path (>=2 batch tiles, ragged dims) --
    B2, N2, H3, H4 = 272, 40, 72, 24
    x2 = jax.random.normal(k_x2, (B2, N2), jnp.float32)
    params2 = (_rand_linear(k_l3, N2, H3), _rand_linear(k_l4, H3, H4))

    ref_out2, ref_good2 = _reference_forward_and_call(x2, params2)
    h2, g2 = ff_chain_forward(x2, params2, use_bf16=False)
    jax.block_until_ready((h2, g2))
    assert h2.shape == (B2, H4) and g2.shape == (B2,)
    assert jnp.allclose(h2, ref_out2, atol=1e-4, rtol=1e-3)
    assert jnp.allclose(g2, ref_good2, atol=1e-4, rtol=1e-3)

    print("KERNEL_OK")
</pallas_src>

<mosaic_0001>
module attributes {stable_mosaic.version = 11 : i64} {
  func.func @kernel(%arg0: i32, %arg1: memref<8x128xf32, #tpu.memory_space<vmem>>, %arg2: memref<128x128xf32, #tpu.memory_space<vmem>>, %arg3: memref<1x128xf32, #tpu.memory_space<vmem>>, %arg4: memref<128x128xf32, #tpu.memory_space<vmem>>, %arg5: memref<1x128xf32, #tpu.memory_space<vmem>>, %arg6: memref<8x128xf32, #tpu.memory_space<vmem>>, %arg7: memref<8x1xf32, #tpu.memory_space<vmem>>) attributes {dimension_semantics = [#tpu.dimension_semantics<parallel>], iteration_bounds = array<i64: 1>, scalar_prefetch = 0 : i64, scratch_operands = 0 : i64, tpu.core_type = #tpu.core_type<tc>, window_params = [{transform_indices = @transform_0, window_bounds = array<i64: 8, 128>}, {pipeline_mode = #tpu.pipeline_mode<synchronous>, transform_indices = @transform_1, window_bounds = array<i64: 128, 128>}, {pipeline_mode = #tpu.pipeline_mode<synchronous>, transform_indices = @transform_2, window_bounds = array<i64: 1, 128>}, {pipeline_mode = #tpu.pipeline_mode<synchronous>, transform_indices = @transform_3, window_bounds = array<i64: 128, 128>}, {pipeline_mode = #tpu.pipeline_mode<synchronous>, transform_indices = @transform_4, window_bounds = array<i64: 1, 128>}, {transform_indices = @transform_5, window_bounds = array<i64: 8, 128>}, {transform_indices = @transform_6, window_bounds = array<i64: 8, 1>}]} {
    %c0 = arith.constant 0 : index
    %c0_0 = arith.constant 0 : index
    %0 = vector.load %arg1[%c0, %c0_0] : memref<8x128xf32, #tpu.memory_space<vmem>>, vector<8x128xf32>
    %1 = arith.mulf %0, %0 : vector<8x128xf32>
    %cst = arith.constant dense<0.000000e+00> : vector<8xf32>
    %2 = vector.multi_reduction <add>, %1, %cst [1] : vector<8x128xf32> to vector<8xf32>
    %3 = vector.shape_cast %2 : vector<8xf32> to vector<8x1xf32>
    %cst_1 = arith.constant 0.000000e+00 : f32
    %4 = vector.broadcast %cst_1 : f32 to vector<8x1xf32>
    %5 = math.sqrt %3 : vector<8x1xf32>
    %cst_2 = arith.constant 9.99999974E-5 : f32
    %6 = vector.broadcast %cst_2 : f32 to vector<8x1xf32>
    %7 = arith.addf %5, %6 : vector<8x1xf32>
    %8 = vector.broadcast %7 : vector<8x1xf32> to vector<8x128xf32>
    %9 = arith.divf %0, %8 : vector<8x128xf32>
    %c0_3 = arith.constant 0 : index
    %c0_4 = arith.constant 0 : index
    %10 = vector.load %arg2[%c0_3, %c0_4] : memref<128x128xf32, #tpu.memory_space<vmem>>, vector<128x128xf32>
    %cst_5 = arith.constant dense<0.000000e+00> : vector<8x128xf32>
    %11 = tpu.matmul %9, %10, %cst_5 {dimension_numbers = #tpu.dot_dimension_numbers<[1], [0], [0], [1], [0, 0, 1, 1], [], []>} : vector<8x128xf32>, vector<128x128xf32>, vector<8x128xf32> -> vector<8x128xf32>
    %c0_6 = arith.constant 0 : index
    %c0_7 = arith.constant 0 : index
    %12 = vector.load %arg3[%c0_6, %c0_7] : memref<1x128xf32, #tpu.memory_space<vmem>>, vector<1x128xf32>
    %13 = vector.broadcast %12 : vector<1x128xf32> to vector<8x128xf32>
    %14 = arith.addf %11, %13 : vector<8x128xf32>
    %cst_8 = arith.constant 0.000000e+00 : f32
    %15 = vector.broadcast %cst_8 : f32 to vector<8x128xf32>
    %16 = arith.maximumf %14, %15 : vector<8x128xf32>
    %17 = arith.mulf %16, %16 : vector<8x128xf32>
    %cst_9 = arith.constant dense<0.000000e+00> : vector<8xf32>
    %18 = vector.multi_reduction <add>, %17, %cst_9 [1] : vector<8x128xf32> to vector<8xf32>
    %19 = vector.shape_cast %18 : vector<8xf32> to vector<8x1xf32>
    %cst_10 = arith.constant 1.562500e-02 : f32
    %20 = vector.broadcast %cst_10 : f32 to vector<8x1xf32>
    %21 = arith.mulf %19, %20 : vector<8x1xf32>
    %22 = arith.addf %4, %21 : vector<8x1xf32>
    %23 = math.sqrt %19 : vector<8x1xf32>
    %cst_11 = arith.constant 9.99999974E-5 : f32
    %24 = vector.broadcast %cst_11 : f32 to vector<8x1xf32>
    %25 = arith.addf %23, %24 : vector<8x1xf32>
    %26 = vector.broadcast %25 : vector<8x1xf32> to vector<8x128xf32>
    %27 = arith.divf %16, %26 : vector<8x128xf32>
    %c0_12 = arith.constant 0 : index
    %c0_13 = arith.constant 0 : index
    %28 = vector.load %arg4[%c0_12, %c0_13] : memref<128x128xf32, #tpu.memory_space<vmem>>, vector<128x128xf32>
    %cst_14 = arith.constant dense<0.000000e+00> : vector<8x128xf32>
    %29 = tpu.matmul %27, %28, %cst_14 {dimension_numbers = #tpu.dot_dimension_numbers<[1], [0], [0], [1], [0, 0, 1, 1], [], []>} : vector<8x128xf32>, vector<128x128xf32>, vector<8x128xf32> -> vector<8x128xf32>
    %c0_15 = arith.constant 0 : index
    %c0_16 = arith.constant 0 : index
    %30 = vector.load %arg5[%c0_15, %c0_16] : memref<1x128xf32, #tpu.memory_space<vmem>>, vector<1x128xf32>
    %31 = vector.broadcast %30 : vector<1x128xf32> to vector<8x128xf32>
    %32 = arith.addf %29, %31 : vector<8x128xf32>
    %cst_17 = arith.constant 0.000000e+00 : f32
    %33 = vector.broadcast %cst_17 : f32 to vector<8x128xf32>
    %34 = arith.maximumf %32, %33 : vector<8x128xf32>
    %35 = arith.mulf %34, %34 : vector<8x128xf32>
    %cst_18 = arith.constant dense<0.000000e+00> : vector<8xf32>
    %36 = vector.multi_reduction <add>, %35, %cst_18 [1] : vector<8x128xf32> to vector<8xf32>
    %37 = vector.shape_cast %36 : vector<8xf32> to vector<8x1xf32>
    %cst_19 = arith.constant 3.125000e-02 : f32
    %38 = vector.broadcast %cst_19 : f32 to vector<8x1xf32>
    %39 = arith.mulf %37, %38 : vector<8x1xf32>
    %40 = arith.addf %22, %39 : vector<8x1xf32>
    %c0_20 = arith.constant 0 : index
    %c0_21 = arith.constant 0 : index
    %41 = vector.load %arg6[%c0_20, %c0_21] : memref<8x128xf32, #tpu.memory_space<vmem>>, vector<8x128xf32>
    tpu.vector_store %arg6[%c0_20, %c0_21], %34 {strides = array<i32>} : memref<8x128xf32, #tpu.memory_space<vmem>>, vector<8x128xf32>,
    %c0_22 = arith.constant 0 : index
    %c0_23 = arith.constant 0 : index
    %42 = vector.load %arg7[%c0_22, %c0_23] : memref<8x1xf32, #tpu.memory_space<vmem>>, vector<8x1xf32>
    tpu.vector_store %arg7[%c0_22, %c0_23], %40 {strides = array<i32>} : memref<8x1xf32, #tpu.memory_space<vmem>>, vector<8x1xf32>,
    return
  }
  func.func @transform_0(%arg0: i32) -> (i32, i32) {
    %c0_i32 = arith.constant 0 : i32
    %c0_i32_0 = arith.constant 0 : i32
    return %arg0, %c0_i32 : i32, i32
  }
  func.func @transform_1(%arg0: i32) -> (i32, i32) {
    %c0_i32 = arith.constant 0 : i32
    %c0_i32_0 = arith.constant 0 : i32
    %c0_i32_1 = arith.constant 0 : i32
    return %c0_i32, %c0_i32_0 : i32, i32
  }
  func.func @transform_2(%arg0: i32) -> (i32, i32) {
    %c0_i32 = arith.constant 0 : i32
    %c0_i32_0 = arith.constant 0 : i32
    %c0_i32_1 = arith.constant 0 : i32
    return %c0_i32, %c0_i32_0 : i32, i32
  }
  func.func @transform_3(%arg0: i32) -> (i32, i32) {
    %c0_i32 = arith.constant 0 : i32
    %c0_i32_0 = arith.constant 0 : i32
    %c0_i32_1 = arith.constant 0 : i32
    return %c0_i32, %c0_i32_0 : i32, i32
  }
  func.func @transform_4(%arg0: i32) -> (i32, i32) {
    %c0_i32 = arith.constant 0 : i32
    %c0_i32_0 = arith.constant 0 : i32
    %c0_i32_1 = arith.constant 0 : i32
    return %c0_i32, %c0_i32_0 : i32, i32
  }
  func.func @transform_5(%arg0: i32) -> (i32, i32) {
    %c0_i32 = arith.constant 0 : i32
    %c0_i32_0 = arith.constant 0 : i32
    return %arg0, %c0_i32 : i32, i32
  }
  func.func @transform_6(%arg0: i32) -> (i32, i32) {
    %c0_i32 = arith.constant 0 : i32
    %c0_i32_0 = arith.constant 0 : i32
    return %arg0, %c0_i32 : i32, i32
  }
}

module attributes {stable_mosaic.version = 11 : i64} {
  func.func @kernel(%arg0: i32, %arg1: memref<8x128xf32, #tpu.memory_space<vmem>>, %arg2: memref<128x128xf32, #tpu.memory_space<vmem>>, %arg3: memref<1x128xf32, #tpu.memory_space<vmem>>, %arg4: memref<128x128xf32, #tpu.memory_space<vmem>>, %arg5: memref<1x128xf32, #tpu.memory_space<vmem>>, %arg6: memref<8x128xf32, #tpu.memory_space<vmem>>, %arg7: memref<8x1xf32, #tpu.memory_space<vmem>>) attributes {dimension_semantics = [#tpu.dimension_semantics<parallel>], iteration_bounds = array<i64: 1>, scalar_prefetch = 0 : i64, scratch_operands = 0 : i64, tpu.core_type = #tpu.core_type<tc>, window_params = [{transform_indices = @transform_0, window_bounds = array<i64: 8, 128>}, {pipeline_mode = #tpu.pipeline_mode<synchronous>, transform_indices = @transform_1, window_bounds = array<i64: 128, 128>}, {pipeline_mode = #tpu.pipeline_mode<synchronous>, transform_indices = @transform_2, window_bounds = array<i64: 1, 128>}, {pipeline_mode = #tpu.pipeline_mode<synchronous>, transform_indices = @transform_3, window_bounds = array<i64: 128, 128>}, {pipeline_mode = #tpu.pipeline_mode<synchronous>, transform_indices = @transform_4, window_bounds = array<i64: 1, 128>}, {transform_indices = @transform_5, window_bounds = array<i64: 8, 128>}, {transform_indices = @transform_6, window_bounds = array<i64: 8, 1>}]} {
    %c0 = arith.constant 0 : index
    %c0_0 = arith.constant 0 : index
    %0 = vector.load %arg1[%c0, %c0_0] : memref<8x128xf32, #tpu.memory_space<vmem>>, vector<8x128xf32>
    %1 = arith.mulf %0, %0 : vector<8x128xf32>
    %cst = arith.constant dense<0.000000e+00> : vector<8xf32>
    %2 = vector.multi_reduction <add>, %1, %cst [1] : vector<8x128xf32> to vector<8xf32>
    %3 = vector.shape_cast %2 : vector<8xf32> to vector<8x1xf32>
    %cst_1 = arith.constant 0.000000e+00 : f32
    %4 = vector.broadcast %cst_1 : f32 to vector<8x1xf32>
    %5 = math.sqrt %3 : vector<8x1xf32>
    %cst_2 = arith.constant 9.99999974E-5 : f32
    %6 = vector.broadcast %cst_2 : f32 to vector<8x1xf32>
    %7 = arith.addf %5, %6 : vector<8x1xf32>
    %8 = vector.broadcast %7 : vector<8x1xf32> to vector<8x128xf32>
    %9 = arith.divf %0, %8 : vector<8x128xf32>
    %c0_3 = arith.constant 0 : index
    %c0_4 = arith.constant 0 : index
    %10 = vector.load %arg2[%c0_3, %c0_4] : memref<128x128xf32, #tpu.memory_space<vmem>>, vector<128x128xf32>
    %cst_5 = arith.constant dense<0.000000e+00> : vector<8x128xf32>
    %11 = tpu.matmul %9, %10, %cst_5 {dimension_numbers = #tpu.dot_dimension_numbers<[1], [0], [0], [1], [0, 0, 1, 1], [], []>} : vector<8x128xf32>, vector<128x128xf32>, vector<8x128xf32> -> vector<8x128xf32>
    %c0_6 = arith.constant 0 : index
    %c0_7 = arith.constant 0 : index
    %12 = vector.load %arg3[%c0_6, %c0_7] : memref<1x128xf32, #tpu.memory_space<vmem>>, vector<1x128xf32>
    %13 = vector.broadcast %12 : vector<1x128xf32> to vector<8x128xf32>
    %14 = arith.addf %11, %13 : vector<8x128xf32>
    %cst_8 = arith.constant 0.000000e+00 : f32
    %15 = vector.broadcast %cst_8 : f32 to vector<8x128xf32>
    %16 = arith.maximumf %14, %15 : vector<8x128xf32>
    %17 = arith.mulf %16, %16 : vector<8x128xf32>
    %cst_9 = arith.constant dense<0.000000e+00> : vector<8xf32>
    %18 = vector.multi_reduction <add>, %17, %cst_9 [1] : vector<8x128xf32> to vector<8xf32>
    %19 = vector.shape_cast %18 : vector<8xf32> to vector<8x1xf32>
    %cst_10 = arith.constant 1.562500e-02 : f32
    %20 = vector.broadcast %cst_10 : f32 to vector<8x1xf32>
    %21 = arith.mulf %19, %20 : vector<8x1xf32>
    %22 = arith.addf %4, %21 : vector<8x1xf32>
    %23 = math.sqrt %19 : vector<8x1xf32>
    %cst_11 = arith.constant 9.99999974E-5 : f32
    %24 = vector.broadcast %cst_11 : f32 to vector<8x1xf32>
    %25 = arith.addf %23, %24 : vector<8x1xf32>
    %26 = vector.broadcast %25 : vector<8x1xf32> to vector<8x128xf32>
    %27 = arith.divf %16, %26 : vector<8x128xf32>
    %c0_12 = arith.constant 0 : index
    %c0_13 = arith.constant 0 : index
    %28 = vector.load %arg4[%c0_12, %c0_13] : memref<128x128xf32, #tpu.memory_space<vmem>>, vector<128x128xf32>
    %cst_14 = arith.constant dense<0.000000e+00> : vector<8x128xf32>
    %29 = tpu.matmul %27, %28, %cst_14 {dimension_numbers = #tpu.dot_dimension_numbers<[1], [0], [0], [1], [0, 0, 1, 1], [], []>} : vector<8x128xf32>, vector<128x128xf32>, vector<8x128xf32> -> vector<8x128xf32>
    %c0_15 = arith.constant 0 : index
    %c0_16 = arith.constant 0 : index
    %30 = vector.load %arg5[%c0_15, %c0_16] : memref<1x128xf32, #tpu.memory_space<vmem>>, vector<1x128xf32>
    %31 = vector.broadcast %30 : vector<1x128xf32> to vector<8x128xf32>
    %32 = arith.addf %29, %31 : vector<8x128xf32>
    %cst_17 = arith.constant 0.000000e+00 : f32
    %33 = vector.broadcast %cst_17 : f32 to vector<8x128xf32>
    %34 = arith.maximumf %32, %33 : vector<8x128xf32>
    %35 = arith.mulf %34, %34 : vector<8x128xf32>
    %cst_18 = arith.constant dense<0.000000e+00> : vector<8xf32>
    %36 = vector.multi_reduction <add>, %35, %cst_18 [1] : vector<8x128xf32> to vector<8xf32>
    %37 = vector.shape_cast %36 : vector<8xf32> to vector<8x1xf32>
    %cst_19 = arith.constant 3.125000e-02 : f32
    %38 = vector.broadcast %cst_19 : f32 to vector<8x1xf32>
    %39 = arith.mulf %37, %38 : vector<8x1xf32>
    %40 = arith.addf %22, %39 : vector<8x1xf32>
    %c0_20 = arith.constant 0 : index
    %c0_21 = arith.constant 0 : index
    %41 = vector.load %arg6[%c0_20, %c0_21] : memref<8x128xf32, #tpu.memory_space<vmem>>, vector<8x128xf32>
    tpu.vector_store %arg6[%c0_20, %c0_21], %34 {strides = array<i32>} : memref<8x128xf32, #tpu.memory_space<vmem>>, vector<8x128xf32>,
    %c0_22 = arith.constant 0 : index
    %c0_23 = arith.constant 0 : index
    %42 = vector.load %arg7[%c0_22, %c0_23] : memref<8x1xf32, #tpu.memory_space<vmem>>, vector<8x1xf32>
    tpu.vector_store %arg7[%c0_22, %c0_23], %40 {strides = array<i32>} : memref<8x1xf32, #tpu.memory_space<vmem>>, vector<8x1xf32>,
    return
  }
  func.func @transform_0(%arg0: i32) -> (i32, i32) {
    %c0_i32 = arith.constant 0 : i32
    %c0_i32_0 = arith.constant 0 : i32
    return %arg0, %c0_i32 : i32, i32
  }
  func.func @transform_1(%arg0: i32) -> (i32, i32) {
    %c0_i32 = arith.constant 0 : i32
    %c0_i32_0 = arith.constant 0 : i32
    %c0_i32_1 = arith.constant 0 : i32
    return %c0_i32, %c0_i32_0 : i32, i32
  }
  func.func @transform_2(%arg0: i32) -> (i32, i32) {
    %c0_i32 = arith.constant 0 : i32
    %c0_i32_0 = arith.constant 0 : i32
    %c0_i32_1 = arith.constant 0 : i32
    return %c0_i32, %c0_i32_0 : i32, i32
  }
  func.func @transform_3(%arg0: i32) -> (i32, i32) {
    %c0_i32 = arith.constant 0 : i32
    %c0_i32_0 = arith.constant 0 : i32
    %c0_i32_1 = arith.constant 0 : i32
    return %c0_i32, %c0_i32_0 : i32, i32
  }
  func.func @transform_4(%arg0: i32) -> (i32, i32) {
    %c0_i32 = arith.constant 0 : i32
    %c0_i32_0 = arith.constant 0 : i32
    %c0_i32_1 = arith.constant 0 : i32
    return %c0_i32, %c0_i32_0 : i32, i32
  }
  func.func @transform_5(%arg0: i32) -> (i32, i32) {
    %c0_i32 = arith.constant 0 : i32
    %c0_i32_0 = arith.constant 0 : i32
    return %arg0, %c0_i32 : i32, i32
  }
  func.func @transform_6(%arg0: i32) -> (i32, i32) {
    %c0_i32 = arith.constant 0 : i32
    %c0_i32_0 = arith.constant 0 : i32
    return %arg0, %c0_i32 : i32, i32
  }
}

</mosaic_0001>

<bundles_post_ra>
// kernel: _ff_chain_jit.1
= control target key start
LH: loop header
LB: loop body
LE: loop exit
PB: predicated region body
PF: predicated region fallthrough
CT: control target
= control target key end

     0   :  { %12 = vsyncpa [#allocation3], 0  ;;  %s585_s0 = inlined_call_operand.vmem [shape: f32[8,128], index: 0, kind: input, shape index: {}]   ;;  %s586_s1 = inlined_call_operand.hbm [shape: f32[128,128], index: 1, kind: input, shape index: {}]   ;;  %s587_s2 = inlined_call_operand.vmem [shape: f32[1,128], index: 2, kind: input, shape index: {}]   ;;  %s588_s3 = inlined_call_operand.hbm [shape: f32[128,128], index: 3, kind: input, shape index: {}]   ;;  %s589_s4 = inlined_call_operand.vmem [shape: f32[1,128], index: 4, kind: input, shape index: {}]   ;;  %s590_s5 = inlined_call_operand.hbm [shape: f32[8,128], index: 5, kind: output, shape index: {0}]   ;;  %s591_s6 = inlined_call_operand.vmem [shape: f32[8,1], index: 6, kind: output, shape index: {1}]  }
   0x1   :  { %13 = vsyncpa [#allocation6], 0 }
   0x2   :  { %14 = vsyncpa [#allocation4], 0  ;;  %s483_s21 = smov [#allocation2]  }
   0x3   :  { %s22_s22 = sshll.u32 %s483_s21, 4  ;;  %s23_s22 = int_to_ptr.vmem [resolvable:$true] %s22_s22 }
   0x4   :  { %s425_s23 = scalar_lea.vmem %s23_s22, 2048  ;;  %p430_p1 = scmp.lt.s32.totalorder %s23_s22, %s23_s22 }
   0x5   :  { %p426_p0 = scmp.ne.s32.totalorder %s23_s22, %s425_s23  ;;  %p431_p2 = scmp.lt.s32.totalorder %s425_s23, %s425_s23 }
   0x7   :  { %p432_p3 = por %p431_p2, %p430_p1 }
   0x9   :  { %p433_p4 = pnand %p432_p3, %p426_p0 }
   0xb   :  { %436 = shalt.err (!%p433_p4)
}
   0xc   :  { %s484_s24 = smov 128   ;;  %s485_s25 = smov 8  }
   0xd   :  { %28 = dma.hbm_to_vmem [thread:$0]  %s586_s1, 2048, %s23_s22, [#allocation3], %s484_s24, %s484_s24, %s485_s25  }
   0xe   :  { %s486_s28 = smov [#allocation5]  }
   0xf   :  { %s36_s29 = sshll.u32 %s486_s28, 4  ;;  %s37_s29 = int_to_ptr.vmem [resolvable:$true] %s36_s29 }
  0x10   :  { %s445_s30 = scalar_lea.vmem %s37_s29, 2048  ;;  %p450_p6 = scmp.lt.s32.totalorder %s37_s29, %s37_s29 }
  0x11   :  { %p446_p5 = scmp.ne.s32.totalorder %s37_s29, %s445_s30  ;;  %p451_p7 = scmp.lt.s32.totalorder %s445_s30, %s445_s30 }
  0x13   :  { %p452_p8 = por %p451_p7, %p450_p6 }
  0x15   :  { %p453_p9 = pnand %p452_p8, %p446_p5 }
  0x17   :  { %456 = shalt.err (!%p453_p9)
}
  0x18   :  { %42 = dma.hbm_to_vmem [thread:$0]  %s588_s3, 2048, %s37_s29, [#allocation6], %s484_s24, %s484_s24, %s485_s25  }
  0x19   :  { %477 = dma.done.wait [#allocation3], 2048  }
  0x1a   :  { %478 = vsyncadd [#allocation3], 4294965248 }
  0x1b   :  { %479 = dma.done.wait [#allocation6], 2048  }
  0x1c   :  { %480 = vsyncadd [#allocation6], 4294965248  ;;  %v534_v0 = vld [vmem:[%s585_s0] sm:$0xff]  ;;  %v487_v2 = vmov 0.0   ;;  %v80_v3 = vld [vmem:[#allocation2 + $0x78] sm:$0xff]  ;;  %vm488_vm0 = vmmov 0  }
  0x1d   :  { %v52_v1 = vmul.f32 %v534_v0, %v534_v0  ;;  %332 = vmatprep.subr.mxu0 %v487_v2  ;;  %367 = vmatprep.subr.mxu1 %v487_v2  ;;  %v79_v4 = vld [vmem:[#allocation2 + $0x70] sm:$0xff]  ;;  %v78_v5 = vld [vmem:[#allocation2 + $0x68] sm:$0xff]  ;;  %v77_v6 = vld [vmem:[#allocation2 + $0x60] sm:$0xff]  ;;  %s489_s11 = smov [#allocation7]  }
  0x1e   :  { %333 = vmatpush3.msra.mxu0 %v80_v3  ;;  %v76_v7 = vld [vmem:[#allocation2 + $0x58] sm:$0xff]  ;;  %v75_v8 = vld [vmem:[#allocation2 + $0x50] sm:$0xff]  ;;  %v74_v9 = vld [vmem:[#allocation2 + $0x48] sm:$0xff]  ;;  %364 = vmatprep.mubr.msk.f32.mxu0 %vm488_vm0, %v487_v2  ;;  %s282_s12 = sshll.u32 %s489_s11, 4  ;;  %s283_s12 = int_to_ptr.vmem [resolvable:$true] %s282_s12 }
  0x1f   :  { %53 = vadd.xlane.f32.xlu0 %v52_v1  ;;  %334 = vmatprep.subr.mxu0 %v487_v2  ;;  %v73_v10 = vld [vmem:[#allocation2 + $0x40] sm:$0xff]  ;;  %v72_v11 = vld [vmem:[#allocation2 + $0x38] sm:$0xff]  ;;  %v71_v12 = vld [vmem:[#allocation2 + $0x30] sm:$0xff]  ;;  %s457_s13 = scalar_lea.vmem %s283_s12, 128  ;;  %p462_p11 = scmp.lt.s32.totalorder %s283_s12, %s283_s12 }
  0x20   :  { %335 = vmatpush3.msra.mxu0 %v79_v4  ;;  %v70_v13 = vld [vmem:[#allocation2 + $0x28] sm:$0xff]  ;;  %399 = vmatprep.mubr.msk.f32.mxu1 %vm488_vm0, %v487_v2  ;;  %v69_v14 = vld [vmem:[#allocation2 + $0x20] sm:$0xff]  ;;  %v68_v15 = vld [vmem:[#allocation2 + $0x18] sm:$0xff]  ;;  %p458_p10 = scmp.ne.s32.totalorder %s283_s12, %s457_s13  ;;  %p463_p12 = scmp.lt.s32.totalorder %s457_s13, %s457_s13 }
  0x21   :  { %336 = vmatprep.subr.mxu0 %v487_v2  ;;  %v67_v16 = vld [vmem:[#allocation2 + $0x10] sm:$0xff]  ;;  %v66_v17 = vld [vmem:[#allocation2 + $0x8] sm:$0xff]  ;;  %v65_v18 = vld [vmem:[#allocation2] sm:$0xff] }
  0x22   :  { %337 = vmatpush3.msra.mxu0 %v78_v5  ;;  %v296_v28 = vld [vmem:[%s587_s2] ss:$0 sm:$0xff]  ;;  %v189_v34 = vld [vmem:[#allocation5 + $0x78] sm:$0xff]  ;;  %v188_v35 = vld [vmem:[#allocation5 + $0x70] sm:$0xff]  ;;  %p464_p13 = por %p463_p12, %p462_p11 }
  0x23   :  { %338 = vmatprep.subr.mxu0 %v487_v2  ;;  %368 = vmatpush3.msra.mxu1 %v189_v34  ;;  %v187_v36 = vld [vmem:[#allocation5 + $0x68] sm:$0xff]  ;;  %v186_v37 = vld [vmem:[#allocation5 + $0x60] sm:$0xff]  ;;  %v185_v38 = vld [vmem:[#allocation5 + $0x58] sm:$0xff] }
  0x24   :  { %339 = vmatpush3.msra.mxu0 %v77_v6  ;;  %369 = vmatprep.subr.mxu1 %v487_v2  ;;  %v184_v39 = vld [vmem:[#allocation5 + $0x50] sm:$0xff]  ;;  %v183_v40 = vld [vmem:[#allocation5 + $0x48] sm:$0xff]  ;;  %v182_v41 = vld [vmem:[#allocation5 + $0x40] sm:$0xff]  ;;  %p465_p0 = pnand %p464_p13, %p458_p10 }
  0x25   :  { %340 = vmatprep.subr.mxu0 %v487_v2  ;;  %370 = vmatpush3.msra.mxu1 %v188_v35  ;;  %v181_v42 = vld [vmem:[#allocation5 + $0x38] sm:$0xff]  ;;  %v180_v43 = vld [vmem:[#allocation5 + $0x30] sm:$0xff]  ;;  %v179_v44 = vld [vmem:[#allocation5 + $0x28] sm:$0xff] }
  0x26   :  { %341 = vmatpush3.msra.mxu0 %v76_v7  ;;  %371 = vmatprep.subr.mxu1 %v487_v2  ;;  %v178_v45 = vld [vmem:[#allocation5 + $0x20] sm:$0xff]  ;;  %v177_v46 = vld [vmem:[#allocation5 + $0x18] sm:$0xff]  ;;  %v176_v47 = vld [vmem:[#allocation5 + $0x10] sm:$0xff] }
  0x27   :  { %342 = vmatprep.subr.mxu0 %v487_v2  ;;  %372 = vmatpush3.msra.mxu1 %v187_v36  ;;  %v175_v48 = vld [vmem:[#allocation5 + $0x8] sm:$0xff]  ;;  %v174_v49 = vld [vmem:[#allocation5] sm:$0xff] }
  0x28   :  { %343 = vmatpush3.msra.mxu0 %v75_v8  ;;  %373 = vmatprep.subr.mxu1 %v487_v2  ;;  %v297_v59 = vld [vmem:[%s589_s4] ss:$0 sm:$0xff] }
  0x29   :  { %344 = vmatprep.subr.mxu0 %v487_v2  ;;  %374 = vmatpush3.msra.mxu1 %v186_v37 }
  0x2a   :  { %345 = vmatpush3.msra.mxu0 %v74_v9  ;;  %375 = vmatprep.subr.mxu1 %v487_v2 }
  0x2b   :  { %346 = vmatprep.subr.mxu0 %v487_v2  ;;  %376 = vmatpush3.msra.mxu1 %v185_v38 }
  0x2c   :  { %347 = vmatpush3.msra.mxu0 %v73_v10  ;;  %377 = vmatprep.subr.mxu1 %v487_v2 }
  0x2d   :  { %348 = vmatprep.subr.mxu0 %v487_v2  ;;  %378 = vmatpush3.msra.mxu1 %v184_v39 }
  0x2e   :  { %349 = vmatpush3.msra.mxu0 %v72_v11  ;;  %379 = vmatprep.subr.mxu1 %v487_v2 }
  0x2f   :  { %350 = vmatprep.subr.mxu0 %v487_v2  ;;  %380 = vmatpush3.msra.mxu1 %v183_v40 }
  0x30   :  { %351 = vmatpush3.msra.mxu0 %v71_v12  ;;  %381 = vmatprep.subr.mxu1 %v487_v2 }
  0x31   :  { %352 = vmatprep.subr.mxu0 %v487_v2  ;;  %382 = vmatpush3.msra.mxu1 %v182_v41 }
  0x32   :  { %353 = vmatpush3.msra.mxu0 %v70_v13  ;;  %383 = vmatprep.subr.mxu1 %v487_v2 }
  0x33   :  { %354 = vmatprep.subr.mxu0 %v487_v2  ;;  %384 = vmatpush3.msra.mxu1 %v181_v42 }
  0x34   :  { %355 = vmatpush3.msra.mxu0 %v69_v14  ;;  %385 = vmatprep.subr.mxu1 %v487_v2 }
  0x35   :  { %356 = vmatprep.subr.mxu0 %v487_v2  ;;  %386 = vmatpush3.msra.mxu1 %v180_v43 }
  0x36   :  { %357 = vmatpush3.msra.mxu0 %v68_v15  ;;  %387 = vmatprep.subr.mxu1 %v487_v2 }
  0x37   :  { %358 = vmatprep.subr.mxu0 %v487_v2  ;;  %388 = vmatpush3.msra.mxu1 %v179_v44 }
  0x38   :  { %359 = vmatpush3.msra.mxu0 %v67_v16  ;;  %389 = vmatprep.subr.mxu1 %v487_v2 }
  0x39   :  { %360 = vmatprep.subr.mxu0 %v487_v2  ;;  %390 = vmatpush3.msra.mxu1 %v178_v45 }
  0x3a   :  { %361 = vmatpush3.msra.mxu0 %v66_v17  ;;  %391 = vmatprep.subr.mxu1 %v487_v2 }
  0x3b   :  { %362 = vmatprep.subr.mxu0 %v487_v2  ;;  %392 = vmatpush3.msra.mxu1 %v177_v46 }
  0x3c   :  { %363 = vmatpush3.msra.mxu0 %v65_v18  ;;  %393 = vmatprep.subr.mxu1 %v487_v2 }
  0x3d   :  { %394 = vmatpush3.msra.mxu1 %v176_v47 }
  0x3e   :  { %395 = vmatprep.subr.mxu1 %v487_v2 }
  0x3f   :  { %396 = vmatpush3.msra.mxu1 %v175_v48 }
  0x40   :  { %397 = vmatprep.subr.mxu1 %v487_v2 }
  0x41   :  { %398 = vmatpush3.msra.mxu1 %v174_v49 }
  0xa8   :  { %v54_v19 = vpop.xlane.xlu0 %53 }
  0xa9   :  { %409 = vrsqrt.f32 %v54_v19  ;;  %vm57_vm1 = vcmp.eq.f32.partialorder %v54_v19, inf  ;;  %v60_v22 = vand.u32 2147483648, %v54_v19  ;;  %vm59_vm2 = vcmp.eq.f32.partialorder %v54_v19, 0.0 }
  0xb6   :  { %v410_v20 = vpop.eup %409 }
  0xb7   :  { %v56_v21 = vmul.f32 %v410_v20, %v54_v19 }
  0xb9   :  { %v58_v23 = vsel %vm57_vm1, %v54_v19, %v56_v21 }
  0xba   :  { %v61_v24 = vsel %vm59_vm2, %v60_v22, %v58_v23 }
  0xbb   :  { %v62_v25 = vadd.f32 0.0001, %v61_v24 }
  0xbd   :  { %411 = vrcp.f32 %v62_v25 }
  0xca   :  { %v412_v26 = vpop.eup %411 }
  0xcb   :  { %v64_v27 = vmul.f32 %v412_v26, %v534_v0 }
  0xcd   :  { %365 = vmatmul.mubr.f32.vlgmr.msra.gmra.mxu0 %v64_v27 }
 0x18d   :  { %v154_v29 = vpop.f32.mrf.mxu0 }
 0x18e   :  { %v155_v30 = vadd.f32 %v296_v28, %v154_v29 }
 0x18f   :  { %v366_v31 = vpop.f32.mrf.mxu0 }
 0x190   :  { %v158_v32 = vmax.f32 %v155_v30, 0.0 }
 0x192   :  { %v159_v33 = vmul.f32 %v158_v32, %v158_v32 }
 0x194   :  { %160 = vadd.xlane.f32.xlu0 %v159_v33 }
 0x21d   :  { %v161_v50 = vpop.xlane.xlu0 %160 }
 0x21e   :  { %413 = vrsqrt.f32 %v161_v50  ;;  %vm166_vm3 = vcmp.eq.f32.partialorder %v161_v50, inf  ;;  %v169_v53 = vand.u32 2147483648, %v161_v50  ;;  %vm168_vm4 = vcmp.eq.f32.partialorder %v161_v50, 0.0 }
 0x22b   :  { %v414_v51 = vpop.eup %413 }
 0x22c   :  { %v165_v52 = vmul.f32 %v414_v51, %v161_v50 }
 0x22e   :  { %v167_v54 = vsel %vm166_vm3, %v161_v50, %v165_v52 }
 0x22f   :  { %v170_v55 = vsel %vm168_vm4, %v169_v53, %v167_v54 }
 0x230   :  { %v171_v56 = vadd.f32 0.0001, %v170_v55 }
 0x232   :  { %415 = vrcp.f32 %v171_v56 }
 0x23f   :  { %v416_v57 = vpop.eup %415 }
 0x240   :  { %v173_v58 = vmul.f32 %v416_v57, %v158_v32 }
 0x242   :  { %400 = vmatmul.mubr.f32.vlgmr.msra.gmra.mxu1 %v173_v58 }
 0x302   :  { %v263_v60 = vpop.f32.mrf.mxu1 }
 0x303   :  { %v264_v61 = vadd.f32 %v297_v59, %v263_v60 }
 0x304   :  { %v401_v62 = vpop.f32.mrf.mxu1 }
 0x305   :  { %v267_v63 = vmax.f32 %v264_v61, 0.0 }
 0x307   :  { %273 = vst [vmem:[#allocation7] sm:$0xff] %v267_v63  ;;  %v268_v0 = vmul.f32 %v267_v63, %v267_v63 }
 0x309   :  { %269 = vadd.xlane.f32.xlu1 %v268_v0 }
 0x30a   :  { %468 = shalt.err (!%p465_p0)
}
 0x30b   :  { %285 = dma.vmem_to_hbm [thread:$0]  %s283_s12, 128, %s590_s5, [#allocation4]   ;;  %v162_v2 = vmul.f32 0.015625, %v161_v50  ;;  %vm274_vm5 = vcmask 7168  }
 0x392   :  { %v270_v1 = vpop.xlane.xlu1 %269 }
 0x393   :  { %v271_v3 = vmul.f32 0.03125, %v270_v1 }
 0x395   :  { %v272_v4 = vadd.f32 %v271_v3, %v162_v2 }
 0x397   :  { %275 = vst.msk [vmem:[%s591_s6] sm:$0xff] %vm274_vm5, %v272_v4 }
 0x398   :  { %481 = dma.done.wait [#allocation4], 128  }
 0x399   :  { %482 = vsyncadd [#allocation4], 4294967168 }
 0x39a   :  { %293 = vsyncpa [#allocation3], 1 }
 0x39b   :  { %294 = vsyncpa [#allocation6], 1 }
 0x39c   :  { %295 = vsyncpa [#allocation4], 1 }

// kernel: _ff_chain_jit.1
= control target key start
LH: loop header
LB: loop body
LE: loop exit
PB: predicated region body
PF: predicated region fallthrough
CT: control target
= control target key end

     0   :  { %12 = vsyncpa [#allocation3], 0  ;;  %s585_s0 = inlined_call_operand.vmem [shape: f32[8,128], index: 0, kind: input, shape index: {}]   ;;  %s586_s1 = inlined_call_operand.hbm [shape: f32[128,128], index: 1, kind: input, shape index: {}]   ;;  %s587_s2 = inlined_call_operand.vmem [shape: f32[1,128], index: 2, kind: input, shape index: {}]   ;;  %s588_s3 = inlined_call_operand.hbm [shape: f32[128,128], index: 3, kind: input, shape index: {}]   ;;  %s589_s4 = inlined_call_operand.vmem [shape: f32[1,128], index: 4, kind: input, shape index: {}]   ;;  %s590_s5 = inlined_call_operand.hbm [shape: f32[8,128], index: 5, kind: output, shape index: {0}]   ;;  %s591_s6 = inlined_call_operand.vmem [shape: f32[8,1], index: 6, kind: output, shape index: {1}]  }
   0x1   :  { %13 = vsyncpa [#allocation6], 0 }
   0x2   :  { %14 = vsyncpa [#allocation4], 0  ;;  %s483_s21 = smov [#allocation2]  }
   0x3   :  { %s22_s22 = sshll.u32 %s483_s21, 4  ;;  %s23_s22 = int_to_ptr.vmem [resolvable:$true] %s22_s22 }
   0x4   :  { %s425_s23 = scalar_lea.vmem %s23_s22, 2048  ;;  %p430_p1 = scmp.lt.s32.totalorder %s23_s22, %s23_s22 }
   0x5   :  { %p426_p0 = scmp.ne.s32.totalorder %s23_s22, %s425_s23  ;;  %p431_p2 = scmp.lt.s32.totalorder %s425_s23, %s425_s23 }
   0x7   :  { %p432_p3 = por %p431_p2, %p430_p1 }
   0x9   :  { %p433_p4 = pnand %p432_p3, %p426_p0 }
   0xb   :  { %436 = shalt.err (!%p433_p4)
}
   0xc   :  { %s484_s24 = smov 128   ;;  %s485_s25 = smov 8  }
   0xd   :  { %28 = dma.hbm_to_vmem [thread:$0]  %s586_s1, 2048, %s23_s22, [#allocation3], %s484_s24, %s484_s24, %s485_s25  }
   0xe   :  { %s486_s28 = smov [#allocation5]  }
   0xf   :  { %s36_s29 = sshll.u32 %s486_s28, 4  ;;  %s37_s29 = int_to_ptr.vmem [resolvable:$true] %s36_s29 }
  0x10   :  { %s445_s30 = scalar_lea.vmem %s37_s29, 2048  ;;  %p450_p6 = scmp.lt.s32.totalorder %s37_s29, %s37_s29 }
  0x11   :  { %p446_p5 = scmp.ne.s32.totalorder %s37_s29, %s445_s30  ;;  %p451_p7 = scmp.lt.s32.totalorder %s445_s30, %s445_s30 }
  0x13   :  { %p452_p8 = por %p451_p7, %p450_p6 }
  0x15   :  { %p453_p9 = pnand %p452_p8, %p446_p5 }
  0x17   :  { %456 = shalt.err (!%p453_p9)
}
  0x18   :  { %42 = dma.hbm_to_vmem [thread:$0]  %s588_s3, 2048, %s37_s29, [#allocation6], %s484_s24, %s484_s24, %s485_s25  }
  0x19   :  { %477 = dma.done.wait [#allocation3], 2048  }
  0x1a   :  { %478 = vsyncadd [#allocation3], 4294965248 }
  0x1b   :  { %479 = dma.done.wait [#allocation6], 2048  }
  0x1c   :  { %480 = vsyncadd [#allocation6], 4294965248  ;;  %v534_v0 = vld [vmem:[%s585_s0] sm:$0xff]  ;;  %v487_v2 = vmov 0.0   ;;  %v80_v3 = vld [vmem:[#allocation2 + $0x78] sm:$0xff]  ;;  %vm488_vm0 = vmmov 0  }
  0x1d   :  { %v52_v1 = vmul.f32 %v534_v0, %v534_v0  ;;  %332 = vmatprep.subr.mxu0 %v487_v2  ;;  %367 = vmatprep.subr.mxu1 %v487_v2  ;;  %v79_v4 = vld [vmem:[#allocation2 + $0x70] sm:$0xff]  ;;  %v78_v5 = vld [vmem:[#allocation2 + $0x68] sm:$0xff]  ;;  %v77_v6 = vld [vmem:[#allocation2 + $0x60] sm:$0xff]  ;;  %s489_s11 = smov [#allocation7]  }
  0x1e   :  { %333 = vmatpush3.msra.mxu0 %v80_v3  ;;  %v76_v7 = vld [vmem:[#allocation2 + $0x58] sm:$0xff]  ;;  %v75_v8 = vld [vmem:[#allocation2 + $0x50] sm:$0xff]  ;;  %v74_v9 = vld [vmem:[#allocation2 + $0x48] sm:$0xff]  ;;  %364 = vmatprep.mubr.msk.f32.mxu0 %vm488_vm0, %v487_v2  ;;  %s282_s12 = sshll.u32 %s489_s11, 4  ;;  %s283_s12 = int_to_ptr.vmem [resolvable:$true] %s282_s12 }
  0x1f   :  { %53 = vadd.xlane.f32.xlu0 %v52_v1  ;;  %334 = vmatprep.subr.mxu0 %v487_v2  ;;  %v73_v10 = vld [vmem:[#allocation2 + $0x40] sm:$0xff]  ;;  %v72_v11 = vld [vmem:[#allocation2 + $0x38] sm:$0xff]  ;;  %v71_v12 = vld [vmem:[#allocation2 + $0x30] sm:$0xff]  ;;  %s457_s13 = scalar_lea.vmem %s283_s12, 128  ;;  %p462_p11 = scmp.lt.s32.totalorder %s283_s12, %s283_s12 }
  0x20   :  { %335 = vmatpush3.msra.mxu0 %v79_v4  ;;  %v70_v13 = vld [vmem:[#allocation2 + $0x28] sm:$0xff]  ;;  %399 = vmatprep.mubr.msk.f32.mxu1 %vm488_vm0, %v487_v2  ;;  %v69_v14 = vld [vmem:[#allocation2 + $0x20] sm:$0xff]  ;;  %v68_v15 = vld [vmem:[#allocation2 + $0x18] sm:$0xff]  ;;  %p458_p10 = scmp.ne.s32.totalorder %s283_s12, %s457_s13  ;;  %p463_p12 = scmp.lt.s32.totalorder %s457_s13, %s457_s13 }
  0x21   :  { %336 = vmatprep.subr.mxu0 %v487_v2  ;;  %v67_v16 = vld [vmem:[#allocation2 + $0x10] sm:$0xff]  ;;  %v66_v17 = vld [vmem:[#allocation2 + $0x8] sm:$0xff]  ;;  %v65_v18 = vld [vmem:[#allocation2] sm:$0xff] }
  0x22   :  { %337 = vmatpush3.msra.mxu0 %v78_v5  ;;  %v296_v28 = vld [vmem:[%s587_s2] ss:$0 sm:$0xff]  ;;  %v189_v34 = vld [vmem:[#allocation5 + $0x78] sm:$0xff]  ;;  %v188_v35 = vld [vmem:[#allocation5 + $0x70] sm:$0xff]  ;;  %p464_p13 = por %p463_p12, %p462_p11 }
  0x23   :  { %338 = vmatprep.subr.mxu0 %v487_v2  ;;  %368 = vmatpush3.msra.mxu1 %v189_v34  ;;  %v187_v36 = vld [vmem:[#allocation5 + $0x68] sm:$0xff]  ;;  %v186_v37 = vld [vmem:[#allocation5 + $0x60] sm:$0xff]  ;;  %v185_v38 = vld [vmem:[#allocation5 + $0x58] sm:$0xff] }
  0x24   :  { %339 = vmatpush3.msra.mxu0 %v77_v6  ;;  %369 = vmatprep.subr.mxu1 %v487_v2  ;;  %v184_v39 = vld [vmem:[#allocation5 + $0x50] sm:$0xff]  ;;  %v183_v40 = vld [vmem:[#allocation5 + $0x48] sm:$0xff]  ;;  %v182_v41 = vld [vmem:[#allocation5 + $0x40] sm:$0xff]  ;;  %p465_p0 = pnand %p464_p13, %p458_p10 }
  0x25   :  { %340 = vmatprep.subr.mxu0 %v487_v2  ;;  %370 = vmatpush3.msra.mxu1 %v188_v35  ;;  %v181_v42 = vld [vmem:[#allocation5 + $0x38] sm:$0xff]  ;;  %v180_v43 = vld [vmem:[#allocation5 + $0x30] sm:$0xff]  ;;  %v179_v44 = vld [vmem:[#allocation5 + $0x28] sm:$0xff] }
  0x26   :  { %341 = vmatpush3.msra.mxu0 %v76_v7  ;;  %371 = vmatprep.subr.mxu1 %v487_v2  ;;  %v178_v45 = vld [vmem:[#allocation5 + $0x20] sm:$0xff]  ;;  %v177_v46 = vld [vmem:[#allocation5 + $0x18] sm:$0xff]  ;;  %v176_v47 = vld [vmem:[#allocation5 + $0x10] sm:$0xff] }
  0x27   :  { %342 = vmatprep.subr.mxu0 %v487_v2  ;;  %372 = vmatpush3.msra.mxu1 %v187_v36  ;;  %v175_v48 = vld [vmem:[#allocation5 + $0x8] sm:$0xff]  ;;  %v174_v49 = vld [vmem:[#allocation5] sm:$0xff] }
  0x28   :  { %343 = vmatpush3.msra.mxu0 %v75_v8  ;;  %373 = vmatprep.subr.mxu1 %v487_v2  ;;  %v297_v59 = vld [vmem:[%s589_s4] ss:$0 sm:$0xff] }
  0x29   :  { %344 = vmatprep.subr.mxu0 %v487_v2  ;;  %374 = vmatpush3.msra.mxu1 %v186_v37 }
  0x2a   :  { %345 = vmatpush3.msra.mxu0 %v74_v9  ;;  %375 = vmatprep.subr.mxu1 %v487_v2 }
  0x2b   :  { %346 = vmatprep.subr.mxu0 %v487_v2  ;;  %376 = vmatpush3.msra.mxu1 %v185_v38 }
  0x2c   :  { %347 = vmatpush3.msra.mxu0 %v73_v10  ;;  %377 = vmatprep.subr.mxu1 %v487_v2 }
  0x2d   :  { %348 = vmatprep.subr.mxu0 %v487_v2  ;;  %378 = vmatpush3.msra.mxu1 %v184_v39 }
  0x2e   :  { %349 = vmatpush3.msra.mxu0 %v72_v11  ;;  %379 = vmatprep.subr.mxu1 %v487_v2 }
  0x2f   :  { %350 = vmatprep.subr.mxu0 %v487_v2  ;;  %380 = vmatpush3.msra.mxu1 %v183_v40 }
  0x30   :  { %351 = vmatpush3.msra.mxu0 %v71_v12  ;;  %381 = vmatprep.subr.mxu1 %v487_v2 }
  0x31   :  { %352 = vmatprep.subr.mxu0 %v487_v2  ;;  %382 = vmatpush3.msra.mxu1 %v182_v41 }
  0x32   :  { %353 = vmatpush3.msra.mxu0 %v70_v13  ;;  %383 = vmatprep.subr.mxu1 %v487_v2 }
  0x33   :  { %354 = vmatprep.subr.mxu0 %v487_v2  ;;  %384 = vmatpush3.msra.mxu1 %v181_v42 }
  0x34   :  { %355 = vmatpush3.msra.mxu0 %v69_v14  ;;  %385 = vmatprep.subr.mxu1 %v487_v2 }
  0x35   :  { %356 = vmatprep.subr.mxu0 %v487_v2  ;;  %386 = vmatpush3.msra.mxu1 %v180_v43 }
  0x36   :  { %357 = vmatpush3.msra.mxu0 %v68_v15  ;;  %387 = vmatprep.subr.mxu1 %v487_v2 }
  0x37   :  { %358 = vmatprep.subr.mxu0 %v487_v2  ;;  %388 = vmatpush3.msra.mxu1 %v179_v44 }
  0x38   :  { %359 = vmatpush3.msra.mxu0 %v67_v16  ;;  %389 = vmatprep.subr.mxu1 %v487_v2 }
  0x39   :  { %360 = vmatprep.subr.mxu0 %v487_v2  ;;  %390 = vmatpush3.msra.mxu1 %v178_v45 }
  0x3a   :  { %361 = vmatpush3.msra.mxu0 %v66_v17  ;;  %391 = vmatprep.subr.mxu1 %v487_v2 }
  0x3b   :  { %362 = vmatprep.subr.mxu0 %v487_v2  ;;  %392 = vmatpush3.msra.mxu1 %v177_v46 }
  0x3c   :  { %363 = vmatpush3.msra.mxu0 %v65_v18  ;;  %393 = vmatprep.subr.mxu1 %v487_v2 }
  0x3d   :  { %394 = vmatpush3.msra.mxu1 %v176_v47 }
  0x3e   :  { %395 = vmatprep.subr.mxu1 %v487_v2 }
  0x3f   :  { %396 = vmatpush3.msra.mxu1 %v175_v48 }
  0x40   :  { %397 = vmatprep.subr.mxu1 %v487_v2 }
  0x41   :  { %398 = vmatpush3.msra.mxu1 %v174_v49 }
  0xa8   :  { %v54_v19 = vpop.xlane.xlu0 %53 }
  0xa9   :  { %409 = vrsqrt.f32 %v54_v19  ;;  %vm57_vm1 = vcmp.eq.f32.partialorder %v54_v19, inf  ;;  %v60_v22 = vand.u32 2147483648, %v54_v19  ;;  %vm59_vm2 = vcmp.eq.f32.partialorder %v54_v19, 0.0 }
  0xb6   :  { %v410_v20 = vpop.eup %409 }
  0xb7   :  { %v56_v21 = vmul.f32 %v410_v20, %v54_v19 }
  0xb9   :  { %v58_v23 = vsel %vm57_vm1, %v54_v19, %v56_v21 }
  0xba   :  { %v61_v24 = vsel %vm59_vm2, %v60_v22, %v58_v23 }
  0xbb   :  { %v62_v25 = vadd.f32 0.0001, %v61_v24 }
  0xbd   :  { %411 = vrcp.f32 %v62_v25 }
  0xca   :  { %v412_v26 = vpop.eup %411 }
  0xcb   :  { %v64_v27 = vmul.f32 %v412_v26, %v534_v0 }
  0xcd   :  { %365 = vmatmul.mubr.f32.vlgmr.msra.gmra.mxu0 %v64_v27 }
 0x18d   :  { %v154_v29 = vpop.f32.mrf.mxu0 }
 0x18e   :  { %v155_v30 = vadd.f32 %v296_v28, %v154_v29 }
 0x18f   :  { %v366_v31 = vpop.f32.mrf.mxu0 }
 0x190   :  { %v158_v32 = vmax.f32 %v155_v30, 0.0 }
 0x192   :  { %v159_v33 = vmul.f32 %v158_v32, %v158_v32 }
 0x194   :  { %160 = vadd.xlane.f32.xlu0 %v159_v33 }
 0x21d   :  { %v161_v50 = vpop.xlane.xlu0 %160 }
 0x21e   :  { %413 = vrsqrt.f32 %v161_v50  ;;  %vm166_vm3 = vcmp.eq.f32.partialorder %v161_v50, inf  ;;  %v169_v53 = vand.u32 2147483648, %v161_v50  ;;  %vm168_vm4 = vcmp.eq.f32.partialorder %v161_v50, 0.0 }
 0x22b   :  { %v414_v51 = vpop.eup %413 }
 0x22c   :  { %v165_v52 = vmul.f32 %v414_v51, %v161_v50 }
 0x22e   :  { %v167_v54 = vsel %vm166_vm3, %v161_v50, %v165_v52 }
 0x22f   :  { %v170_v55 = vsel %vm168_vm4, %v169_v53, %v167_v54 }
 0x230   :  { %v171_v56 = vadd.f32 0.0001, %v170_v55 }
 0x232   :  { %415 = vrcp.f32 %v171_v56 }
 0x23f   :  { %v416_v57 = vpop.eup %415 }
 0x240   :  { %v173_v58 = vmul.f32 %v416_v57, %v158_v32 }
 0x242   :  { %400 = vmatmul.mubr.f32.vlgmr.msra.gmra.mxu1 %v173_v58 }
 0x302   :  { %v263_v60 = vpop.f32.mrf.mxu1 }
 0x303   :  { %v264_v61 = vadd.f32 %v297_v59, %v263_v60 }
 0x304   :  { %v401_v62 = vpop.f32.mrf.mxu1 }
 0x305   :  { %v267_v63 = vmax.f32 %v264_v61, 0.0 }
 0x307   :  { %273 = vst [vmem:[#allocation7] sm:$0xff] %v267_v63  ;;  %v268_v0 = vmul.f32 %v267_v63, %v267_v63 }
 0x309   :  { %269 = vadd.xlane.f32.xlu1 %v268_v0 }
 0x30a   :  { %468 = shalt.err (!%p465_p0)
}
 0x30b   :  { %285 = dma.vmem_to_hbm [thread:$0]  %s283_s12, 128, %s590_s5, [#allocation4]   ;;  %v162_v2 = vmul.f32 0.015625, %v161_v50  ;;  %vm274_vm5 = vcmask 7168  }
 0x392   :  { %v270_v1 = vpop.xlane.xlu1 %269 }
 0x393   :  { %v271_v3 = vmul.f32 0.03125, %v270_v1 }
 0x395   :  { %v272_v4 = vadd.f32 %v271_v3, %v162_v2 }
 0x397   :  { %275 = vst.msk [vmem:[%s591_s6] sm:$0xff] %vm274_vm5, %v272_v4 }
 0x398   :  { %481 = dma.done.wait [#allocation4], 128  }
 0x399   :  { %482 = vsyncadd [#allocation4], 4294967168 }
 0x39a   :  { %293 = vsyncpa [#allocation3], 1 }
 0x39b   :  { %294 = vsyncpa [#allocation6], 1 }
 0x39c   :  { %295 = vsyncpa [#allocation4], 1 }

</bundles_post_ra>
